<compile_context>
chip_gen: v5e
topology: v5e:2x2
jax: 0.10.0
libtpu: 0.0.40
codegen_flags: <defaults>
</compile_context>

<pallas_src>
import functools

import jax
import jax.numpy as jnp
from jax.experimental import pallas as pl
from jax.experimental.pallas import tpu as pltpu

_LANES = 128


def _cdiv(a, b):
    return -(-a // b)


def _round_up(a, b):
    return _cdiv(a, b) * b


def _mlp_ce_kernel(x_ref, yc_ref, w_ref, scal_ref, logits_ref, loss_ref, *,
                   hidden):
    """One batch tile: 3x (Linear + ReLU) + per-sample CE, lane-packed.

    Layout: each 128-lane row holds GROUPS = 128 // hidden consecutive
    samples; sample g of a row occupies lanes [g*hidden, (g+1)*hidden).
    """
    h = hidden
    groups = _LANES // h
    bits = (h - 1).bit_length()            # log2(h); h is a power of two
    bpg = bits + 1                         # per-group bit field: [valid | y]

    xp = x_ref[...]                                        # [R, 128] f32
    w1t = w_ref[0:1, :]                                    # fc1.weight tiled [1,128]
    w3t = w_ref[1:2, :]                                    # fc3.weight tiled [1,128]
    b3t = w_ref[2:3, :]                                    # fc3.bias   tiled [1,128]
    b1 = scal_ref[0]                                       # fc1.bias   (SMEM scalar)
    w2 = scal_ref[1]                                       # fc2.weight (SMEM scalar)
    b2 = scal_ref[2]                                       # fc2.bias   (SMEM scalar)

    lane = jax.lax.broadcasted_iota(jnp.int32, xp.shape, 1)
    pos = lane & (h - 1)                                   # lane index inside group
    grp = lane >> bits                                     # group id of each lane

    # Masks for the segmented (within-group) butterfly, shared by all three
    # reductions below.
    shifts = [1 << k for k in range(bits)]
    in_seg = [pos >= s for s in shifts]

    def seg_allreduce(t, combine):
        # Cyclic recursive doubling inside each h-lane group: after log2(h)
        # steps every lane holds combine() over its whole group.  The rolls
        # land on the XLU slot (slack), the select/combine on the VPU.
        for s, mk in zip(shifts, in_seg):
            fwd = pltpu.roll(t, shift=s, axis=1)                  # t[lane - s]
            wrap = pltpu.roll(t, shift=s + _LANES - h, axis=1)    # t[lane - s + h]
            t = combine(t, jnp.where(mk, fwd, wrap))
        return t

    # fc1: Linear(h,1) + ReLU -> VPU multiply + segmented lane reduce (no MXU).
    h1 = jnp.maximum(seg_allreduce(xp * w1t, jnp.add) + b1, 0.0)
    # fc2: Linear(1,1) + ReLU -> scale + shift.
    h2 = jnp.maximum(h1 * w2 + b2, 0.0)
    # fc3: Linear(1,h) + ReLU -> broadcast multiply fused with bias + ReLU.
    h3 = jnp.maximum(h2 * w3t + b3t, 0.0)
    logits_ref[...] = h3                                   # dense, unmasked store

    # Per-sample (per-group) numerically stable logsumexp, broadcast within
    # each group by the butterfly itself.
    m = seg_allreduce(h3, jnp.maximum)
    p = jnp.exp(h3 - m)
    lse = m + jnp.log(seg_allreduce(p, jnp.add))

    # Target logit: one int32 code per packed row holding GROUPS (valid, y)
    # fields.  Unrolled constant shifts + selects (GROUPS is tiny).
    code = yc_ref[...]                                     # [R, 1] int32
    ytgt = jnp.zeros_like(lane)
    vmsk = jnp.zeros(xp.shape, jnp.float32)
    for g in range(groups):
        in_g = grp == g
        ytgt = jnp.where(in_g, (code >> (g * bpg)) & (h - 1), ytgt)
        vmsk = jnp.where(
            in_g, ((code >> (g * bpg + bits)) & 1).astype(jnp.float32), vmsk)
    tgt = jnp.where(pos == ytgt, h3, 0.0)

    # Per-lane loss contribution; summing a group's h lanes yields
    # (lse - target_logit) for that sample, and 0 for padding samples.
    per_lane = vmsk * (lse * (1.0 / h) - tgt)

    # Per-tile partial sum written as a lane-dense (8,128) block (one value
    # broadcast over sublanes; the wrapper divides by 8).  No per-sample loss
    # stream to HBM.
    part = jnp.sum(per_lane, axis=0, keepdims=True)        # [1, 128]
    loss_ref[...] = jnp.broadcast_to(part, loss_ref.shape)


def pack_params(params):
    """Pack the six tiny parameters into (wslab [3,128] VMEM, scal (3,) SMEM).

    Do this ONCE per parameter set (hoisted out of the per-step forward)."""
    fc1_w, fc1_b, fc2_w, fc2_b, fc3_w, fc3_b = params
    h = fc1_w.reshape(-1).shape[0]
    groups = _LANES // h
    wslab = jnp.stack([
        jnp.tile(fc1_w.reshape(h).astype(jnp.float32), groups),   # fc1.weight
        jnp.tile(fc3_w.reshape(h).astype(jnp.float32), groups),   # fc3.weight^T
        jnp.tile(fc3_b.reshape(h).astype(jnp.float32), groups),   # fc3.bias
    ], axis=0)                                                    # [3, 128]
    scal = jnp.concatenate([fc1_b.reshape(1), fc2_w.reshape(1),
                            fc2_b.reshape(1)]).astype(jnp.float32)  # (3,)
    return wslab, scal


def _choose_tiling(rows):
    """Pick (tile_rows, num_tiles) for `rows` packed 128-lane rows."""
    if rows < 64:                        # tiny batch: one full-array tile
        return rows, 1
    cap = 8192                           # 4 MiB x-tile; ~16 MiB double-buffered
    nt = max(2, _cdiv(rows, cap))        # >=2 tiles so both v7x TCs get work
    tile = _round_up(_cdiv(rows, nt), 8)
    return tile, _cdiv(rows, tile)


def mymodel_forward(x, y, wslab, scal):
    """x: [B,H] float, y: [B] int class ids, (wslab, scal) from pack_params.

    Returns (logits [B,H] f32, mean cross-entropy loss), matching
    MyModel.forward.  Out-of-range targets are clamped to [0,H) instead of
    raising like torch.nn.CrossEntropyLoss."""
    B, H = x.shape
    assert H in (32, 64, 128), "kernel specialised for hidden_dim in {32,64,128}"
    groups = _LANES // H
    bits = (H - 1).bit_length()
    bpg = bits + 1

    rows = _cdiv(B, groups)
    tile_rows, nt = _choose_tiling(rows)
    rows_p = nt * tile_rows
    b_p = rows_p * groups

    # Lane-pack x: [B,H] -> [rows_p, 128] (free row-major reshape, zero-padded).
    xf = x.astype(jnp.float32)
    if b_p != B:
        xf = jnp.pad(xf, ((0, b_p - B), (0, 0)))
    xp = xf.reshape(rows_p, _LANES)

    # Pack GROUPS (valid, target) fields into one int32 per packed row.
    # TODO(synk): torch.nn.CrossEntropyLoss raises on out-of-range targets;
    # here they are clamped into range instead.
    yi = jnp.clip(y.astype(jnp.int32).reshape(B), 0, H - 1)
    if b_p != B:
        yi = jnp.pad(yi, (0, b_p - B))
    valid = (jnp.arange(b_p, dtype=jnp.int32) < B).astype(jnp.int32)
    field = (valid << bits) | (yi * valid)
    gshift = (jnp.arange(groups, dtype=jnp.int32) * bpg)[None, :]
    ycode = jnp.sum(field.reshape(rows_p, groups) << gshift, axis=1,
                    dtype=jnp.int32).reshape(rows_p, 1)

    logits_p, loss_parts = pl.pallas_call(
        functools.partial(_mlp_ce_kernel, hidden=H),
        grid=(nt,),
        out_shape=(
            jax.ShapeDtypeStruct((rows_p, _LANES), jnp.float32),   # packed logits
            jax.ShapeDtypeStruct((nt * 8, _LANES), jnp.float32),   # tile partials
        ),
        in_specs=[
            pl.BlockSpec((tile_rows, _LANES), lambda i: (i, 0)),   # x (packed)
            pl.BlockSpec((tile_rows, 1), lambda i: (i, 0)),        # y codes
            pl.BlockSpec((3, _LANES), lambda i: (0, 0)),           # param slab
            pl.BlockSpec(memory_space=pltpu.MemorySpace.SMEM),     # 3 scalars
        ],
        out_specs=(
            pl.BlockSpec((tile_rows, _LANES), lambda i: (i, 0)),   # packed logits
            pl.BlockSpec((8, _LANES), lambda i: (i, 0)),           # loss partials
        ),
        compiler_params=pltpu.CompilerParams(
            dimension_semantics=("parallel",)),
    )(xp, ycode, wslab, scal)

    logits = logits_p.reshape(b_p, H)[:B]
    loss = jnp.sum(loss_parts) / (8.0 * B)   # /8: partials are sublane-broadcast
    return logits, loss


def init_params(key, hidden_dim):
    """PyTorch-shaped params: Linear(H,1), Linear(1,1), Linear(1,H), with
    torch's default U(-1/sqrt(fan_in), 1/sqrt(fan_in)) init."""
    k1, k2, k3, k4, k5, k6 = jax.random.split(key, 6)
    lim1 = 1.0 / jnp.sqrt(hidden_dim)   # fc1 fan_in = H
    lim2 = 1.0                          # fc2 / fc3 fan_in = 1
    fc1_w = jax.random.uniform(k1, (1, hidden_dim), jnp.float32, -lim1, lim1)
    fc1_b = jax.random.uniform(k2, (1,), jnp.float32, -lim1, lim1)
    fc2_w = jax.random.uniform(k3, (1, 1), jnp.float32, -lim2, lim2)
    fc2_b = jax.random.uniform(k4, (1,), jnp.float32, -lim2, lim2)
    fc3_w = jax.random.uniform(k5, (hidden_dim, 1), jnp.float32, -lim2, lim2)
    fc3_b = jax.random.uniform(k6, (hidden_dim,), jnp.float32, -lim2, lim2)
    return (fc1_w, fc1_b, fc2_w, fc2_b, fc3_w, fc3_b)


def _ref_forward(x, y, params):
    """Pure-JAX reference of MyModel.forward for a correctness check."""
    fc1_w, fc1_b, fc2_w, fc2_b, fc3_w, fc3_b = params
    h = jnp.maximum(x @ fc1_w.T + fc1_b, 0.0)
    h = jnp.maximum(h @ fc2_w.T + fc2_b, 0.0)
    h = jnp.maximum(h @ fc3_w.T + fc3_b, 0.0)
    lse = jax.nn.logsumexp(h, axis=-1)
    tgt = jnp.take_along_axis(h, y[:, None], axis=-1)[:, 0]
    return h, jnp.mean(lse - tgt)


if __name__ == "__main__":
    hidden_dim = 32
    batch = 8

    key = jax.random.PRNGKey(0)
    kx, ky, kp = jax.random.split(key, 3)
    x = jax.random.normal(kx, (batch, hidden_dim), dtype=jnp.float32)
    y = jax.random.randint(ky, (batch,), 0, hidden_dim, dtype=jnp.int32)
    params = init_params(kp, hidden_dim)

    # Parameter packing hoisted out of the per-call path (perf feedback).
    wslab, scal = pack_params(params)
    fwd = jax.jit(mymodel_forward)

    logits, loss = fwd(x, y, wslab, scal)
    jax.block_until_ready((logits, loss))

    assert logits.shape == (batch, hidden_dim)
    assert loss.shape == ()

    ref_logits, ref_loss = _ref_forward(x, y, params)
    assert jnp.allclose(logits, ref_logits, atol=1e-3, rtol=1e-3), "logits mismatch"
    assert jnp.allclose(loss, ref_loss, atol=1e-3, rtol=1e-3), "loss mismatch"

    print("KERNEL_OK")
</pallas_src>

<mosaic_0001>
module attributes {stable_mosaic.version = 11 : i64} {
  func.func @_mlp_ce_kernel(%arg0: i32, %arg1: memref<2x128xf32, #tpu.memory_space<vmem>>, %arg2: memref<2x1xi32, #tpu.memory_space<vmem>>, %arg3: memref<3x128xf32, #tpu.memory_space<vmem>>, %arg4: memref<3xf32, #tpu.memory_space<smem>>, %arg5: memref<2x128xf32, #tpu.memory_space<vmem>>, %arg6: memref<8x128xf32, #tpu.memory_space<vmem>>) attributes {dimension_semantics = [#tpu.dimension_semantics<parallel>], iteration_bounds = array<i64: 1>, scalar_prefetch = 0 : i64, scratch_operands = 0 : i64, tpu.core_type = #tpu.core_type<tc>, window_params = [{transform_indices = @transform_0, window_bounds = array<i64: 2, 128>}, {transform_indices = @transform_1, window_bounds = array<i64: 2, 1>}, {pipeline_mode = #tpu.pipeline_mode<synchronous>, transform_indices = @transform_2, window_bounds = array<i64: 3, 128>}, {transform_indices = @transform_3, window_bounds = array<i64: 3>}, {transform_indices = @transform_4, window_bounds = array<i64: 2, 128>}, {transform_indices = @transform_5, window_bounds = array<i64: 8, 128>}]} {
    %c0 = arith.constant 0 : index
    %c0_0 = arith.constant 0 : index
    %0 = vector.load %arg1[%c0, %c0_0] : memref<2x128xf32, #tpu.memory_space<vmem>>, vector<2x128xf32>
    %c0_1 = arith.constant 0 : index
    %c0_2 = arith.constant 0 : index
    %1 = vector.load %arg3[%c0_1, %c0_2] : memref<3x128xf32, #tpu.memory_space<vmem>>, vector<1x128xf32>
    %c1 = arith.constant 1 : index
    %c0_3 = arith.constant 0 : index
    %2 = vector.load %arg3[%c1, %c0_3] : memref<3x128xf32, #tpu.memory_space<vmem>>, vector<1x128xf32>
    %c2 = arith.constant 2 : index
    %c0_4 = arith.constant 0 : index
    %3 = vector.load %arg3[%c2, %c0_4] : memref<3x128xf32, #tpu.memory_space<vmem>>, vector<1x128xf32>
    %c0_5 = arith.constant 0 : index
    %4 = memref.load %arg4[%c0_5] : memref<3xf32, #tpu.memory_space<smem>>
    %c1_6 = arith.constant 1 : index
    %5 = memref.load %arg4[%c1_6] : memref<3xf32, #tpu.memory_space<smem>>
    %c2_7 = arith.constant 2 : index
    %6 = memref.load %arg4[%c2_7] : memref<3xf32, #tpu.memory_space<smem>>
    %7 = tpu.iota {dimensions = array<i32: 1>} : vector<2x128xi32>
    %c31_i32 = arith.constant 31 : i32
    %8 = vector.broadcast %c31_i32 : i32 to vector<2x128xi32>
    %9 = arith.andi %7, %8 : vector<2x128xi32>
    %c5_i32 = arith.constant 5 : i32
    %10 = vector.broadcast %c5_i32 : i32 to vector<2x128xi32>
    %11 = arith.shrsi %7, %10 : vector<2x128xi32>
    %c1_i32 = arith.constant 1 : i32
    %12 = vector.broadcast %c1_i32 : i32 to vector<2x128xi32>
    %13 = arith.cmpi sge, %9, %12 : vector<2x128xi32>
    %c2_i32 = arith.constant 2 : i32
    %14 = vector.broadcast %c2_i32 : i32 to vector<2x128xi32>
    %15 = arith.cmpi sge, %9, %14 : vector<2x128xi32>
    %c4_i32 = arith.constant 4 : i32
    %16 = vector.broadcast %c4_i32 : i32 to vector<2x128xi32>
    %17 = arith.cmpi sge, %9, %16 : vector<2x128xi32>
    %c8_i32 = arith.constant 8 : i32
    %18 = vector.broadcast %c8_i32 : i32 to vector<2x128xi32>
    %19 = arith.cmpi sge, %9, %18 : vector<2x128xi32>
    %c16_i32 = arith.constant 16 : i32
    %20 = vector.broadcast %c16_i32 : i32 to vector<2x128xi32>
    %21 = arith.cmpi sge, %9, %20 : vector<2x128xi32>
    %22 = vector.broadcast %1 : vector<1x128xf32> to vector<2x128xf32>
    %23 = arith.mulf %0, %22 : vector<2x128xf32>
    %c1_i32_8 = arith.constant 1 : i32
    %24 = tpu.dynamic_rotate %23 by %c1_i32_8 dim 1 : vector<2x128xf32>, i32 -> vector<2x128xf32>
    %c97_i32 = arith.constant 97 : i32
    %25 = tpu.dynamic_rotate %23 by %c97_i32 dim 1 : vector<2x128xf32>, i32 -> vector<2x128xf32>
    %26 = arith.select %13, %24, %25 : vector<2x128xi1>, vector<2x128xf32>
    %27 = arith.addf %23, %26 : vector<2x128xf32>
    %c2_i32_9 = arith.constant 2 : i32
    %28 = tpu.dynamic_rotate %27 by %c2_i32_9 dim 1 : vector<2x128xf32>, i32 -> vector<2x128xf32>
    %c98_i32 = arith.constant 98 : i32
    %29 = tpu.dynamic_rotate %27 by %c98_i32 dim 1 : vector<2x128xf32>, i32 -> vector<2x128xf32>
    %30 = arith.select %15, %28, %29 : vector<2x128xi1>, vector<2x128xf32>
    %31 = arith.addf %27, %30 : vector<2x128xf32>
    %c4_i32_10 = arith.constant 4 : i32
    %32 = tpu.dynamic_rotate %31 by %c4_i32_10 dim 1 : vector<2x128xf32>, i32 -> vector<2x128xf32>
    %c100_i32 = arith.constant 100 : i32
    %33 = tpu.dynamic_rotate %31 by %c100_i32 dim 1 : vector<2x128xf32>, i32 -> vector<2x128xf32>
    %34 = arith.select %17, %32, %33 : vector<2x128xi1>, vector<2x128xf32>
    %35 = arith.addf %31, %34 : vector<2x128xf32>
    %c8_i32_11 = arith.constant 8 : i32
    %36 = tpu.dynamic_rotate %35 by %c8_i32_11 dim 1 : vector<2x128xf32>, i32 -> vector<2x128xf32>
    %c104_i32 = arith.constant 104 : i32
    %37 = tpu.dynamic_rotate %35 by %c104_i32 dim 1 : vector<2x128xf32>, i32 -> vector<2x128xf32>
    %38 = arith.select %19, %36, %37 : vector<2x128xi1>, vector<2x128xf32>
    %39 = arith.addf %35, %38 : vector<2x128xf32>
    %c16_i32_12 = arith.constant 16 : i32
    %40 = tpu.dynamic_rotate %39 by %c16_i32_12 dim 1 : vector<2x128xf32>, i32 -> vector<2x128xf32>
    %c112_i32 = arith.constant 112 : i32
    %41 = tpu.dynamic_rotate %39 by %c112_i32 dim 1 : vector<2x128xf32>, i32 -> vector<2x128xf32>
    %42 = arith.select %21, %40, %41 : vector<2x128xi1>, vector<2x128xf32>
    %43 = arith.addf %39, %42 : vector<2x128xf32>
    %44 = vector.broadcast %4 : f32 to vector<2x128xf32>
    %45 = arith.addf %43, %44 : vector<2x128xf32>
    %cst = arith.constant 0.000000e+00 : f32
    %46 = vector.broadcast %cst : f32 to vector<2x128xf32>
    %47 = arith.maximumf %45, %46 : vector<2x128xf32>
    %48 = vector.broadcast %5 : f32 to vector<2x128xf32>
    %49 = arith.mulf %47, %48 : vector<2x128xf32>
    %50 = vector.broadcast %6 : f32 to vector<2x128xf32>
    %51 = arith.addf %49, %50 : vector<2x128xf32>
    %cst_13 = arith.constant 0.000000e+00 : f32
    %52 = vector.broadcast %cst_13 : f32 to vector<2x128xf32>
    %53 = arith.maximumf %51, %52 : vector<2x128xf32>
    %54 = vector.broadcast %2 : vector<1x128xf32> to vector<2x128xf32>
    %55 = arith.mulf %53, %54 : vector<2x128xf32>
    %56 = vector.broadcast %3 : vector<1x128xf32> to vector<2x128xf32>
    %57 = arith.addf %55, %56 : vector<2x128xf32>
    %cst_14 = arith.constant 0.000000e+00 : f32
    %58 = vector.broadcast %cst_14 : f32 to vector<2x128xf32>
    %59 = arith.maximumf %57, %58 : vector<2x128xf32>
    %c0_15 = arith.constant 0 : index
    %c0_16 = arith.constant 0 : index
    %60 = vector.load %arg5[%c0_15, %c0_16] : memref<2x128xf32, #tpu.memory_space<vmem>>, vector<2x128xf32>
    tpu.vector_store %arg5[%c0_15, %c0_16], %59 {strides = array<i32>} : memref<2x128xf32, #tpu.memory_space<vmem>>, vector<2x128xf32>,
    %c1_i32_17 = arith.constant 1 : i32
    %61 = tpu.dynamic_rotate %59 by %c1_i32_17 dim 1 : vector<2x128xf32>, i32 -> vector<2x128xf32>
    %c97_i32_18 = arith.constant 97 : i32
    %62 = tpu.dynamic_rotate %59 by %c97_i32_18 dim 1 : vector<2x128xf32>, i32 -> vector<2x128xf32>
    %63 = arith.select %13, %61, %62 : vector<2x128xi1>, vector<2x128xf32>
    %64 = arith.maximumf %59, %63 : vector<2x128xf32>
    %c2_i32_19 = arith.constant 2 : i32
    %65 = tpu.dynamic_rotate %64 by %c2_i32_19 dim 1 : vector<2x128xf32>, i32 -> vector<2x128xf32>
    %c98_i32_20 = arith.constant 98 : i32
    %66 = tpu.dynamic_rotate %64 by %c98_i32_20 dim 1 : vector<2x128xf32>, i32 -> vector<2x128xf32>
    %67 = arith.select %15, %65, %66 : vector<2x128xi1>, vector<2x128xf32>
    %68 = arith.maximumf %64, %67 : vector<2x128xf32>
    %c4_i32_21 = arith.constant 4 : i32
    %69 = tpu.dynamic_rotate %68 by %c4_i32_21 dim 1 : vector<2x128xf32>, i32 -> vector<2x128xf32>
    %c100_i32_22 = arith.constant 100 : i32
    %70 = tpu.dynamic_rotate %68 by %c100_i32_22 dim 1 : vector<2x128xf32>, i32 -> vector<2x128xf32>
    %71 = arith.select %17, %69, %70 : vector<2x128xi1>, vector<2x128xf32>
    %72 = arith.maximumf %68, %71 : vector<2x128xf32>
    %c8_i32_23 = arith.constant 8 : i32
    %73 = tpu.dynamic_rotate %72 by %c8_i32_23 dim 1 : vector<2x128xf32>, i32 -> vector<2x128xf32>
    %c104_i32_24 = arith.constant 104 : i32
    %74 = tpu.dynamic_rotate %72 by %c104_i32_24 dim 1 : vector<2x128xf32>, i32 -> vector<2x128xf32>
    %75 = arith.select %19, %73, %74 : vector<2x128xi1>, vector<2x128xf32>
    %76 = arith.maximumf %72, %75 : vector<2x128xf32>
    %c16_i32_25 = arith.constant 16 : i32
    %77 = tpu.dynamic_rotate %76 by %c16_i32_25 dim 1 : vector<2x128xf32>, i32 -> vector<2x128xf32>
    %c112_i32_26 = arith.constant 112 : i32
    %78 = tpu.dynamic_rotate %76 by %c112_i32_26 dim 1 : vector<2x128xf32>, i32 -> vector<2x128xf32>
    %79 = arith.select %21, %77, %78 : vector<2x128xi1>, vector<2x128xf32>
    %80 = arith.maximumf %76, %79 : vector<2x128xf32>
    %81 = arith.subf %59, %80 : vector<2x128xf32>
    %82 = math.exp %81 : vector<2x128xf32>
    %c1_i32_27 = arith.constant 1 : i32
    %83 = tpu.dynamic_rotate %82 by %c1_i32_27 dim 1 : vector<2x128xf32>, i32 -> vector<2x128xf32>
    %c97_i32_28 = arith.constant 97 : i32
    %84 = tpu.dynamic_rotate %82 by %c97_i32_28 dim 1 : vector<2x128xf32>, i32 -> vector<2x128xf32>
    %85 = arith.select %13, %83, %84 : vector<2x128xi1>, vector<2x128xf32>
    %86 = arith.addf %82, %85 : vector<2x128xf32>
    %c2_i32_29 = arith.constant 2 : i32
    %87 = tpu.dynamic_rotate %86 by %c2_i32_29 dim 1 : vector<2x128xf32>, i32 -> vector<2x128xf32>
    %c98_i32_30 = arith.constant 98 : i32
    %88 = tpu.dynamic_rotate %86 by %c98_i32_30 dim 1 : vector<2x128xf32>, i32 -> vector<2x128xf32>
    %89 = arith.select %15, %87, %88 : vector<2x128xi1>, vector<2x128xf32>
    %90 = arith.addf %86, %89 : vector<2x128xf32>
    %c4_i32_31 = arith.constant 4 : i32
    %91 = tpu.dynamic_rotate %90 by %c4_i32_31 dim 1 : vector<2x128xf32>, i32 -> vector<2x128xf32>
    %c100_i32_32 = arith.constant 100 : i32
    %92 = tpu.dynamic_rotate %90 by %c100_i32_32 dim 1 : vector<2x128xf32>, i32 -> vector<2x128xf32>
    %93 = arith.select %17, %91, %92 : vector<2x128xi1>, vector<2x128xf32>
    %94 = arith.addf %90, %93 : vector<2x128xf32>
    %c8_i32_33 = arith.constant 8 : i32
    %95 = tpu.dynamic_rotate %94 by %c8_i32_33 dim 1 : vector<2x128xf32>, i32 -> vector<2x128xf32>
    %c104_i32_34 = arith.constant 104 : i32
    %96 = tpu.dynamic_rotate %94 by %c104_i32_34 dim 1 : vector<2x128xf32>, i32 -> vector<2x128xf32>
    %97 = arith.select %19, %95, %96 : vector<2x128xi1>, vector<2x128xf32>
    %98 = arith.addf %94, %97 : vector<2x128xf32>
    %c16_i32_35 = arith.constant 16 : i32
    %99 = tpu.dynamic_rotate %98 by %c16_i32_35 dim 1 : vector<2x128xf32>, i32 -> vector<2x128xf32>
    %c112_i32_36 = arith.constant 112 : i32
    %100 = tpu.dynamic_rotate %98 by %c112_i32_36 dim 1 : vector<2x128xf32>, i32 -> vector<2x128xf32>
    %101 = arith.select %21, %99, %100 : vector<2x128xi1>, vector<2x128xf32>
    %102 = arith.addf %98, %101 : vector<2x128xf32>
    %103 = math.log %102 : vector<2x128xf32>
    %104 = arith.addf %80, %103 : vector<2x128xf32>
    %c0_37 = arith.constant 0 : index
    %c0_38 = arith.constant 0 : index
    %105 = vector.load %arg2[%c0_37, %c0_38] : memref<2x1xi32, #tpu.memory_space<vmem>>, vector<2x1xi32>
    %c0_i32 = arith.constant 0 : i32
    %106 = vector.broadcast %c0_i32 : i32 to vector<2x128xi32>
    %cst_39 = arith.constant 0.000000e+00 : f32
    %107 = vector.broadcast %cst_39 : f32 to vector<2x128xf32>
    %c0_i32_40 = arith.constant 0 : i32
    %108 = vector.broadcast %c0_i32_40 : i32 to vector<2x128xi32>
    %109 = arith.cmpi eq, %11, %108 : vector<2x128xi32>
    %c0_i32_41 = arith.constant 0 : i32
    %110 = vector.broadcast %c0_i32_41 : i32 to vector<2x1xi32>
    %111 = arith.shrsi %105, %110 : vector<2x1xi32>
    %c31_i32_42 = arith.constant 31 : i32
    %112 = vector.broadcast %c31_i32_42 : i32 to vector<2x1xi32>
    %113 = arith.andi %111, %112 : vector<2x1xi32>
    %114 = vector.shape_cast %113 : vector<2x1xi32> to vector<2x1xi32>
    %115 = vector.broadcast %114 : vector<2x1xi32> to vector<2x128xi32>
    %116 = arith.select %109, %115, %106 : vector<2x128xi1>, vector<2x128xi32>
    %c5_i32_43 = arith.constant 5 : i32
    %117 = vector.broadcast %c5_i32_43 : i32 to vector<2x1xi32>
    %118 = arith.shrsi %105, %117 : vector<2x1xi32>
    %c1_i32_44 = arith.constant 1 : i32
    %119 = vector.broadcast %c1_i32_44 : i32 to vector<2x1xi32>
    %120 = arith.andi %118, %119 : vector<2x1xi32>
    %121 = arith.sitofp %120 : vector<2x1xi32> to vector<2x1xf32>
    %122 = vector.shape_cast %121 : vector<2x1xf32> to vector<2x1xf32>
    %123 = vector.broadcast %122 : vector<2x1xf32> to vector<2x128xf32>
    %124 = arith.select %109, %123, %107 : vector<2x128xi1>, vector<2x128xf32>
    %c1_i32_45 = arith.constant 1 : i32
    %125 = vector.broadcast %c1_i32_45 : i32 to vector<2x128xi32>
    %126 = arith.cmpi eq, %11, %125 : vector<2x128xi32>
    %c6_i32 = arith.constant 6 : i32
    %127 = vector.broadcast %c6_i32 : i32 to vector<2x1xi32>
    %128 = arith.shrsi %105, %127 : vector<2x1xi32>
    %c31_i32_46 = arith.constant 31 : i32
    %129 = vector.broadcast %c31_i32_46 : i32 to vector<2x1xi32>
    %130 = arith.andi %128, %129 : vector<2x1xi32>
    %131 = vector.shape_cast %130 : vector<2x1xi32> to vector<2x1xi32>
    %132 = vector.broadcast %131 : vector<2x1xi32> to vector<2x128xi32>
    %133 = arith.select %126, %132, %116 : vector<2x128xi1>, vector<2x128xi32>
    %c11_i32 = arith.constant 11 : i32
    %134 = vector.broadcast %c11_i32 : i32 to vector<2x1xi32>
    %135 = arith.shrsi %105, %134 : vector<2x1xi32>
    %c1_i32_47 = arith.constant 1 : i32
    %136 = vector.broadcast %c1_i32_47 : i32 to vector<2x1xi32>
    %137 = arith.andi %135, %136 : vector<2x1xi32>
    %138 = arith.sitofp %137 : vector<2x1xi32> to vector<2x1xf32>
    %139 = vector.shape_cast %138 : vector<2x1xf32> to vector<2x1xf32>
    %140 = vector.broadcast %139 : vector<2x1xf32> to vector<2x128xf32>
    %141 = arith.select %126, %140, %124 : vector<2x128xi1>, vector<2x128xf32>
    %c2_i32_48 = arith.constant 2 : i32
    %142 = vector.broadcast %c2_i32_48 : i32 to vector<2x128xi32>
    %143 = arith.cmpi eq, %11, %142 : vector<2x128xi32>
    %c12_i32 = arith.constant 12 : i32
    %144 = vector.broadcast %c12_i32 : i32 to vector<2x1xi32>
    %145 = arith.shrsi %105, %144 : vector<2x1xi32>
    %c31_i32_49 = arith.constant 31 : i32
    %146 = vector.broadcast %c31_i32_49 : i32 to vector<2x1xi32>
    %147 = arith.andi %145, %146 : vector<2x1xi32>
    %148 = vector.shape_cast %147 : vector<2x1xi32> to vector<2x1xi32>
    %149 = vector.broadcast %148 : vector<2x1xi32> to vector<2x128xi32>
    %150 = arith.select %143, %149, %133 : vector<2x128xi1>, vector<2x128xi32>
    %c17_i32 = arith.constant 17 : i32
    %151 = vector.broadcast %c17_i32 : i32 to vector<2x1xi32>
    %152 = arith.shrsi %105, %151 : vector<2x1xi32>
    %c1_i32_50 = arith.constant 1 : i32
    %153 = vector.broadcast %c1_i32_50 : i32 to vector<2x1xi32>
    %154 = arith.andi %152, %153 : vector<2x1xi32>
    %155 = arith.sitofp %154 : vector<2x1xi32> to vector<2x1xf32>
    %156 = vector.shape_cast %155 : vector<2x1xf32> to vector<2x1xf32>
    %157 = vector.broadcast %156 : vector<2x1xf32> to vector<2x128xf32>
    %158 = arith.select %143, %157, %141 : vector<2x128xi1>, vector<2x128xf32>
    %c3_i32 = arith.constant 3 : i32
    %159 = vector.broadcast %c3_i32 : i32 to vector<2x128xi32>
    %160 = arith.cmpi eq, %11, %159 : vector<2x128xi32>
    %c18_i32 = arith.constant 18 : i32
    %161 = vector.broadcast %c18_i32 : i32 to vector<2x1xi32>
    %162 = arith.shrsi %105, %161 : vector<2x1xi32>
    %c31_i32_51 = arith.constant 31 : i32
    %163 = vector.broadcast %c31_i32_51 : i32 to vector<2x1xi32>
    %164 = arith.andi %162, %163 : vector<2x1xi32>
    %165 = vector.shape_cast %164 : vector<2x1xi32> to vector<2x1xi32>
    %166 = vector.broadcast %165 : vector<2x1xi32> to vector<2x128xi32>
    %167 = arith.select %160, %166, %150 : vector<2x128xi1>, vector<2x128xi32>
    %c23_i32 = arith.constant 23 : i32
    %168 = vector.broadcast %c23_i32 : i32 to vector<2x1xi32>
    %169 = arith.shrsi %105, %168 : vector<2x1xi32>
    %c1_i32_52 = arith.constant 1 : i32
    %170 = vector.broadcast %c1_i32_52 : i32 to vector<2x1xi32>
    %171 = arith.andi %169, %170 : vector<2x1xi32>
    %172 = arith.sitofp %171 : vector<2x1xi32> to vector<2x1xf32>
    %173 = vector.shape_cast %172 : vector<2x1xf32> to vector<2x1xf32>
    %174 = vector.broadcast %173 : vector<2x1xf32> to vector<2x128xf32>
    %175 = arith.select %160, %174, %158 : vector<2x128xi1>, vector<2x128xf32>
    %176 = arith.cmpi eq, %9, %167 : vector<2x128xi32>
    %cst_53 = arith.constant 0.000000e+00 : f32
    %177 = vector.broadcast %cst_53 : f32 to vector<2x128xf32>
    %178 = arith.select %176, %59, %177 : vector<2x128xi1>, vector<2x128xf32>
    %cst_54 = arith.constant 3.125000e-02 : f32
    %179 = vector.broadcast %cst_54 : f32 to vector<2x128xf32>
    %180 = arith.mulf %104, %179 : vector<2x128xf32>
    %181 = arith.subf %180, %178 : vector<2x128xf32>
    %182 = arith.mulf %175, %181 : vector<2x128xf32>
    %cst_55 = arith.constant dense<0.000000e+00> : vector<128xf32>
    %183 = vector.multi_reduction <add>, %182, %cst_55 [0] : vector<2x128xf32> to vector<128xf32>
    %184 = vector.shape_cast %183 : vector<128xf32> to vector<1x128xf32>
    %185 = vector.shape_cast %184 : vector<1x128xf32> to vector<1x128xf32>
    %186 = vector.broadcast %185 : vector<1x128xf32> to vector<8x128xf32>
    %c0_56 = arith.constant 0 : index
    %c0_57 = arith.constant 0 : index
    %187 = vector.load %arg6[%c0_56, %c0_57] : memref<8x128xf32, #tpu.memory_space<vmem>>, vector<8x128xf32>
    tpu.vector_store %arg6[%c0_56, %c0_57], %186 {strides = array<i32>} : memref<8x128xf32, #tpu.memory_space<vmem>>, vector<8x128xf32>,
    return
  }
  func.func @transform_0(%arg0: i32) -> (i32, i32) {
    %c0_i32 = arith.constant 0 : i32
    %c0_i32_0 = arith.constant 0 : i32
    return %arg0, %c0_i32 : i32, i32
  }
  func.func @transform_1(%arg0: i32) -> (i32, i32) {
    %c0_i32 = arith.constant 0 : i32
    %c0_i32_0 = arith.constant 0 : i32
    return %arg0, %c0_i32 : i32, i32
  }
  func.func @transform_2(%arg0: i32) -> (i32, i32) {
    %c0_i32 = arith.constant 0 : i32
    %c0_i32_0 = arith.constant 0 : i32
    %c0_i32_1 = arith.constant 0 : i32
    return %c0_i32, %c0_i32_0 : i32, i32
  }
  func.func @transform_3(%arg0: i32) -> i32 {
    %c0_i32 = arith.constant 0 : i32
    %c0_i32_0 = arith.constant 0 : i32
    return %c0_i32 : i32
  }
  func.func @transform_4(%arg0: i32) -> (i32, i32) {
    %c0_i32 = arith.constant 0 : i32
    %c0_i32_0 = arith.constant 0 : i32
    return %arg0, %c0_i32 : i32, i32
  }
  func.func @transform_5(%arg0: i32) -> (i32, i32) {
    %c0_i32 = arith.constant 0 : i32
    %c0_i32_0 = arith.constant 0 : i32
    return %arg0, %c0_i32 : i32, i32
  }
}

</mosaic_0001>

<bundles_post_ra>
// kernel: mymodel_forward.1
= control target key start
LH: loop header
LB: loop body
LE: loop exit
PB: predicated region body
PF: predicated region fallthrough
CT: control target
= control target key end

     0   :  { %11 = vsyncpa [#allocation3], 0  ;;  %s285_s21 = smov [#allocation2]   ;;  %s443_s0 = inlined_call_operand.vmem [shape: f32[2,128], index: 0, kind: input, shape index: {}]   ;;  %s444_s1 = inlined_call_operand.vmem [shape: s32[2,1], index: 1, kind: input, shape index: {}]   ;;  %s445_s2 = inlined_call_operand.vmem [shape: f32[3,128], index: 2, kind: input, shape index: {}]   ;;  %s446_s3 = inlined_call_operand.vmem [shape: f32[3], index: 3, kind: input, shape index: {}]   ;;  %s447_s4 = inlined_call_operand.vmem [shape: f32[2,128], index: 4, kind: output, shape index: {0}]   ;;  %s448_s5 = inlined_call_operand.vmem [shape: f32[8,128], index: 5, kind: output, shape index: {1}]  }
   0x1   :  { %s23_s20 = sshll.u32 %s446_s3, 4  ;;  %s24_s20 = int_to_ptr.vmem [resolvable:$true] %s23_s20 }
   0x2   :  { %26 = dma.vmem_to_smem %s24_s20, 16, %s285_s21, [#allocation3]  }
   0x3   :  { %283 = dma.done.wait [#allocation3], 16  }
   0x4   :  { %284 = vsyncadd [#allocation3], 4294967280 }
   0x5   :  { %31 = sfence }
   0x6   :  { %v32_v0 = vld [vmem:[%s443_s0] sm:$0x3]  ;;  %s286_s26 = smov 1   ;;  %s287_s27 = smov 97   ;;  %v39_v3 = vlaneseq  ;;  %v266_v34 = vld [vmem:[%s445_s2 + $0x2] ss:$0 sm:$0xff] }
   0x7   :  { %v264_v1 = vld [vmem:[%s445_s2] ss:$0 sm:$0xff]  ;;  %s288_s0 = smov 2   ;;  %s289_s3 = smov 98   ;;  %v265_v32 = vld [vmem:[%s445_s2 + $0x1] ss:$0 sm:$0xff] }
   0x8   :  { %v49_v2 = vmul.f32 %v264_v1, %v32_v0  ;;  %v338_v4 = vand.u32 127, %v39_v3  ;;  %s290_s28 = smov 4   ;;  %s291_s29 = smov 100   ;;  %vm229_vm10 = vcmask 1041408  }
   0x9   :  { %s292_s30 = smov 104   ;;  %s293_s6 = smov 8  }
   0xa   :  { %50 = vrot.lane.b32.xlu0 %v49_v2, %s286_s26  ;;  %v341_v6 = vand.u32 31, %v338_v4  ;;  %s294_s7 = smov 112   ;;  %s295_s8 = smov 16  }
   0xb   :  { %s36_s9 = sld [smem:[#allocation2]] }
   0xc   :  { %vm43_vm0 = vcmp.ge.s32.totalorder %v341_v6, 1  ;;  %vm44_vm1 = vcmp.ge.s32.totalorder %v341_v6, 2  ;;  %vm45_vm2 = vcmp.ge.s32.totalorder %v341_v6, 4  ;;  %vm46_vm3 = vcmp.ge.s32.totalorder %v341_v6, 8  ;;  %s247_s10 = sld [smem:[#allocation2 + $0x1]] }
   0xd   :  { %vm47_vm4 = vcmp.ge.s32.totalorder %v341_v6, 16  ;;  %s248_s11 = sld [smem:[#allocation2 + $0x2]] }
  0x11   :  { %v80_v24 = vstv %s36_s9 }
  0x12   :  { %52 = vrot.lane.b32.xlu0 %v49_v2, %s287_s27  ;;  %v83_v28 = vstv %s247_s10 }
  0x13   :  { %v85_v30 = vstv %s248_s11 }
  0x7c   :  { %v51_v5 = vpop.permute.xlu0 %50 }
  0x84   :  { %v53_v7 = vpop.permute.xlu0 %52 }
  0x85   :  { %v54_v8 = vsel %vm43_vm0, %v51_v5, %v53_v7 }
  0x86   :  { %v55_v9 = vadd.f32 %v54_v8, %v49_v2 }
  0x88   :  { %56 = vrot.lane.b32.xlu1 %v55_v9, %s288_s0 }
  0x90   :  { %58 = vrot.lane.b32.xlu1 %v55_v9, %s289_s3 }
  0xfa   :  { %v57_v10 = vpop.permute.xlu1 %56 }
 0x102   :  { %v59_v11 = vpop.permute.xlu1 %58 }
 0x103   :  { %v60_v12 = vsel %vm44_vm1, %v57_v10, %v59_v11 }
 0x104   :  { %v61_v13 = vadd.f32 %v60_v12, %v55_v9  ;;  %v160_v12 = vld [vmem:[%s444_s1] sm:$0x3] }
 0x106   :  { %62 = vrot.lane.b32.xlu2 %v61_v13, %s290_s28 }
 0x10e   :  { %64 = vrot.lane.b32.xlu2 %v61_v13, %s291_s29 }
 0x160   :  { %v63_v14 = vpop.permute.xlu2 %62 }
 0x168   :  { %v65_v15 = vpop.permute.xlu2 %64 }
 0x169   :  { %v66_v16 = vsel %vm45_vm2, %v63_v14, %v65_v15  ;;  %v162_v14 = vand.u32 31, %v160_v12  ;;  %v177_v15 = vshra.s32 %v160_v12, 6 }
 0x16a   :  { %v67_v17 = vadd.f32 %v66_v16, %v61_v13  ;;  %v296_v13 = vmov 0  }
 0x16b   :  { %261 = vset.pattern.permute.xlu0 %v296_v13  ;;  %262 = vset.pattern.permute.xlu1 %v296_v13  ;;  %v178_v16 = vand.u32 31, %v177_v15 }
 0x16c   :  { %70 = vrot.lane.b32.xlu1 %v67_v17, %s292_s30  ;;  %68 = vrot.lane.b32.xlu0 %v67_v17, %s293_s6 }
 0x16d   :  { %263 = vset.pattern.permute.xlu2 %v296_v13 }
 0x1de   :  { %v71_v18 = vpop.permute.xlu1 %70  ;;  %v69_v19 = vpop.permute.xlu0 %68 }
 0x1df   :  { %v72_v20 = vsel %vm46_vm3, %v69_v19, %v71_v18 }
 0x1e0   :  { %v73_v21 = vadd.f32 %v72_v20, %v67_v17  ;;  %v183_v17 = vshra.s32 %v160_v12, 11 }
 0x1e2   :  { %76 = vrot.lane.b32.xlu0 %v73_v21, %s294_s7  ;;  %74 = vrot.lane.b32.xlu2 %v73_v21, %s295_s8  ;;  %v184_v18 = vand.u32 1, %v183_v17 }
 0x1e4   :  { %v185_v19 = vcvt.s32.f32 %v184_v18 }
 0x23c   :  { %v75_v22 = vpop.permute.xlu2 %74 }
 0x254   :  { %v77_v23 = vpop.permute.xlu0 %76 }
 0x255   :  { %v78_v25 = vsel %vm47_vm4, %v75_v22, %v77_v23 }
 0x256   :  { %v79_v26 = vadd.f32 %v78_v25, %v73_v21  ;;  %v193_v25 = vshra.s32 %v160_v12, 12 }
 0x258   :  { %v81_v27 = vadd.f32 %v80_v24, %v79_v26  ;;  %v209_v24 = vshra.s32 %v160_v12, 18 }
 0x25a   :  { %v82_v29 = vmax.f32 %v81_v27, 0.0  ;;  %v210_v26 = vand.u32 31, %v209_v24  ;;  %v194_v27 = vand.u32 31, %v193_v25 }
 0x25c   :  { %v84_v31 = vmul.f32 %v83_v28, %v82_v29  ;;  %v199_v28 = vshra.s32 %v160_v12, 17  ;;  %v167_v29 = vshra.s32 %v160_v12, 5 }
 0x25e   :  { %v86_v33 = vadd.f32 %v85_v30, %v84_v31  ;;  %v200_v30 = vand.u32 1, %v199_v28  ;;  %v168_v31 = vand.u32 1, %v167_v29 }
 0x260   :  { %v87_v35 = vmax.f32 %v86_v33, 0.0  ;;  %v169_v33 = vcvt.s32.f32 %v168_v31 }
 0x262   :  { %v89_v36 = vmul.f32 %v265_v32, %v87_v35  ;;  %v201_v32 = vcvt.s32.f32 %v200_v30 }
 0x264   :  { %v91_v37 = vadd.f32 %v266_v34, %v89_v36  ;;  %v215_v34 = vshra.s32 %v160_v12, 23 }
 0x266   :  { %v372_v38 = vmax.f32 %v91_v37, 0.0  ;;  %v216_v35 = vand.u32 1, %v215_v34 }
 0x268   :  { %93 = vst [vmem:[%s447_s4] sm:$0x3] %v372_v38  ;;  %96 = vrot.lane.b32.xlu2 %v372_v38, %s287_s27  ;;  %94 = vrot.lane.b32.xlu1 %v372_v38, %s286_s26  ;;  %v217_v36 = vcvt.s32.f32 %v216_v35 }
 0x2c2   :  { %v97_v39 = vpop.permute.xlu2 %96 }
 0x2da   :  { %v95_v40 = vpop.permute.xlu1 %94 }
 0x2db   :  { %v98_v41 = vsel %vm43_vm0, %v95_v40, %v97_v39  ;;  %v42_v40 = vshra.s32 %v338_v4, 5 }
 0x2dc   :  { %v99_v42 = vmax.f32 %v372_v38, %v98_v41 }
 0x2dd   :  { %vm161_vm5 = vcmp.eq.s32.totalorder %v42_v40, 0  ;;  %vm176_vm6 = vcmp.eq.s32.totalorder %v42_v40, 1  ;;  %vm192_vm7 = vcmp.eq.s32.totalorder %v42_v40, 2  ;;  %vm208_vm8 = vcmp.eq.s32.totalorder %v42_v40, 3 }
 0x2de   :  { %102 = vrot.lane.b32.xlu1 %v99_v42, %s289_s3  ;;  %100 = vrot.lane.b32.xlu0 %v99_v42, %s288_s0 }
 0x350   :  { %v103_v43 = vpop.permute.xlu1 %102  ;;  %v101_v44 = vpop.permute.xlu0 %100 }
 0x351   :  { %v104_v45 = vsel %vm44_vm1, %v101_v44, %v103_v43 }
 0x352   :  { %v105_v46 = vmax.f32 %v99_v42, %v104_v45 }
 0x354   :  { %108 = vrot.lane.b32.xlu0 %v105_v46, %s291_s29  ;;  %106 = vrot.lane.b32.xlu2 %v105_v46, %s290_s28 }
 0x3ae   :  { %v107_v47 = vpop.permute.xlu2 %106 }
 0x3c6   :  { %v109_v48 = vpop.permute.xlu0 %108 }
 0x3c7   :  { %v110_v49 = vsel %vm45_vm2, %v107_v47, %v109_v48 }
 0x3c8   :  { %v111_v50 = vmax.f32 %v105_v46, %v110_v49 }
 0x3ca   :  { %114 = vrot.lane.b32.xlu2 %v111_v50, %s292_s30  ;;  %112 = vrot.lane.b32.xlu1 %v111_v50, %s293_s6 }
 0x424   :  { %v115_v51 = vpop.permute.xlu2 %114 }
 0x43c   :  { %v113_v52 = vpop.permute.xlu1 %112 }
 0x43d   :  { %v116_v53 = vsel %vm46_vm3, %v113_v52, %v115_v51 }
 0x43e   :  { %v117_v54 = vmax.f32 %v111_v50, %v116_v53 }
 0x440   :  { %120 = vrot.lane.b32.xlu1 %v117_v54, %s294_s7  ;;  %118 = vrot.lane.b32.xlu0 %v117_v54, %s295_s8 }
 0x4b2   :  { %v121_v55 = vpop.permute.xlu1 %120  ;;  %v119_v56 = vpop.permute.xlu0 %118 }
 0x4b3   :  { %v122_v57 = vsel %vm47_vm4, %v119_v56, %v121_v55 }
 0x4b4   :  { %v401_v58 = vmax.f32 %v117_v54, %v122_v57 }
 0x4b6   :  { %v124_v59 = vsub.f32 %v372_v38, %v401_v58 }
 0x4b8   :  { %v125_v60 = vmul.f32 1.442695, %v124_v59 }
 0x4ba   :  { %267 = vpow2.f32 %v125_v60 }
 0x4c0   :  { %v268_v61 = vpop.eup %267 }
 0x4c1   :  { %129 = vrot.lane.b32.xlu0 %v268_v61, %s287_s27  ;;  %127 = vrot.lane.b32.xlu2 %v268_v61, %s286_s26 }
 0x51b   :  { %v128_v62 = vpop.permute.xlu2 %127 }
 0x533   :  { %v130_v63 = vpop.permute.xlu0 %129 }
 0x534   :  { %v131_v0 = vsel %vm43_vm0, %v128_v62, %v130_v63 }
 0x535   :  { %v132_v1 = vadd.f32 %v268_v61, %v131_v0 }
 0x537   :  { %135 = vrot.lane.b32.xlu2 %v132_v1, %s289_s3  ;;  %133 = vrot.lane.b32.xlu1 %v132_v1, %s288_s0 }
 0x591   :  { %v136_v2 = vpop.permute.xlu2 %135 }
 0x5a9   :  { %v134_v3 = vpop.permute.xlu1 %133 }
 0x5aa   :  { %v137_v5 = vsel %vm44_vm1, %v134_v3, %v136_v2 }
 0x5ab   :  { %v138_v7 = vadd.f32 %v137_v5, %v132_v1 }
 0x5ad   :  { %141 = vrot.lane.b32.xlu1 %v138_v7, %s291_s29  ;;  %139 = vrot.lane.b32.xlu0 %v138_v7, %s290_s28 }
 0x5b5   :  { %180 = vperm.xlu1 %262, %v178_v16  }
 0x61f   :  { %v142_v8 = vpop.permute.xlu1 %141  ;;  %v140_v9 = vpop.permute.xlu0 %139 }
 0x620   :  { %v143_v10 = vsel %vm45_vm2, %v140_v9, %v142_v8 }
 0x621   :  { %v144_v11 = vadd.f32 %v143_v10, %v138_v7 }
 0x623   :  { %147 = vrot.lane.b32.xlu0 %v144_v11, %s292_s30  ;;  %145 = vrot.lane.b32.xlu2 %v144_v11, %s293_s6 }
 0x627   :  { %v181_v39 = vpop.permute.xlu1 %180 }
 0x62b   :  { %164 = vperm.xlu0 %261, %v162_v14  }
 0x633   :  { %188 = vperm.xlu0 %261, %v185_v19  }
 0x67d   :  { %v146_v20 = vpop.permute.xlu2 %145 }
 0x695   :  { %v148_v21 = vpop.permute.xlu0 %147 }
 0x696   :  { %v149_v22 = vsel %vm46_vm3, %v146_v20, %v148_v21 }
 0x697   :  { %v150_v23 = vadd.f32 %v149_v22, %v144_v11 }
 0x699   :  { %153 = vrot.lane.b32.xlu2 %v150_v23, %s294_s7  ;;  %151 = vrot.lane.b32.xlu1 %v150_v23, %s295_s8 }
 0x69d   :  { %v165_v42 = vpop.permute.xlu0 %164 }
 0x69e   :  { %v166_v46 = vsel %vm161_vm5, %v165_v42, 0 }
 0x69f   :  { %v182_v47 = vsel %vm176_vm6, %v181_v39, %v166_v46 }
 0x6a1   :  { %212 = vperm.xlu1 %262, %v210_v26   ;;  %196 = vperm.xlu2 %263, %v194_v27  }
 0x6a5   :  { %v189_v55 = vpop.permute.xlu0 %188 }
 0x6a9   :  { %204 = vperm.xlu1 %262, %v201_v32   ;;  %172 = vperm.xlu2 %263, %v169_v33  }
 0x6b1   :  { %220 = vperm.xlu2 %263, %v217_v36  }
 0x6f3   :  { %v154_v37 = vpop.permute.xlu2 %153 }
 0x6fb   :  { %v197_v41 = vpop.permute.xlu2 %196 }
 0x6fc   :  { %v198_v4 = vsel %vm192_vm7, %v197_v41, %v182_v47 }
 0x703   :  { %v173_v48 = vpop.permute.xlu2 %172 }
 0x704   :  { %v175_v53 = vsel %vm161_vm5, %v173_v48, 0.0 }
 0x705   :  { %v191_v57 = vsel %vm176_vm6, %v189_v55, %v175_v53 }
 0x70b   :  { %v152_v43 = vpop.permute.xlu1 %151  ;;  %v221_v61 = vpop.permute.xlu2 %220 }
 0x70c   :  { %v155_v44 = vsel %vm47_vm4, %v152_v43, %v154_v37 }
 0x70d   :  { %v156_v45 = vadd.f32 %v155_v44, %v150_v23 }
 0x70f   :  { %269 = vlog2.f32 %v156_v45 }
 0x713   :  { %v213_v49 = vpop.permute.xlu1 %212 }
 0x714   :  { %v214_v51 = vsel %vm208_vm8, %v213_v49, %v198_v4 }
 0x715   :  { %v270_v50 = vpop.eup %269  ;;  %vm224_vm9 = vcmp.eq.s32.totalorder %v341_v6, %v214_v51 }
 0x716   :  { %v158_v52 = vmul.f32 0.6931472, %v270_v50  ;;  %v225_v59 = vsel %vm224_vm9, %v372_v38, 0.0 }
 0x718   :  { %v159_v54 = vadd.f32 %v158_v52, %v401_v58 }
 0x71a   :  { %v226_v56 = vmul.f32 0.03125, %v159_v54 }
 0x71b   :  { %v205_v60 = vpop.permute.xlu1 %204 }
 0x71c   :  { %v227_v62 = vsub.f32 %v226_v56, %v225_v59  ;;  %v207_v63 = vsel %vm192_vm7, %v205_v60, %v191_v57 }
 0x71d   :  { %v223_v0 = vsel %vm208_vm8, %v221_v61, %v207_v63 }
 0x71e   :  { %v228_v1 = vmul.f32 %v227_v62, %v223_v0 }
 0x720   :  { %v230_v2 = vsel %vm229_vm10, %v228_v1, 0.0 }
 0x721   :  { %v231_v3 = vrot.slane %v230_v2, 4 }
 0x723   :  { %v232_v58 = vadd.f32 %v231_v3, %v230_v2 }
 0x725   :  { %v233_v5 = vrot.slane %v232_v58, 2 }
 0x727   :  { %v234_v7 = vadd.f32 %v233_v5, %v232_v58 }
 0x729   :  { %v235_v6 = vrot.slane %v234_v7, 1 }
 0x72b   :  { %v236_v8 = vadd.f32 %v235_v6, %v234_v7 }
 0x72d   :  { %237 = vst [vmem:[%s448_s5] sm:$0xff] %v236_v8 }
 0x72e   :  { %246 = vsyncpa [#allocation3], 1 }

</bundles_post_ra>
